<compile_context>
chip_gen: v7x
topology: tpu7x:2x2x1
jax: 0.10.0
libtpu: 0.0.40
codegen_flags: <defaults>
</compile_context>

<pallas_src>
import jax
import jax.numpy as jnp
from jax.experimental import pallas as pl
from jax.experimental.pallas import tpu as pltpu

_LANES = 128


def _ceil_to(x, m):
    return -(-x // m) * m


def _choose_tiles(n_sublanes, dtype):
    """Pick the sublane tile TS for (1, TS, 128) blocks.

    Targets ~1 MiB per block buffer. Returns (TS, n_ftiles).
      * If the whole row fits in one block, TS == n_sublanes (full dim block,
        exempt from the (8,128) divisibility rule -> no padding needed).
      * Otherwise TS is a multiple of the dtype's native sublane quantum and
        the final partial F-tile is handled by Pallas edge-block masking.
    """
    itemsize = jnp.dtype(dtype).itemsize
    quantum = max(8, 32 // itemsize)                 # 8 f32 / 16 bf16 / 32 int8
    ts_max = (1 << 20) // (_LANES * itemsize)        # ~1 MiB per block buffer
    if n_sublanes <= ts_max:
        return n_sublanes, 1                         # one full-row block
    n_tiles = -(-n_sublanes // ts_max)
    ts = _ceil_to(-(-n_sublanes // n_tiles), quantum)
    return ts, -(-n_sublanes // ts)


def _mixup_x_kernel(perm_ref,          # scalar-prefetch: int32[B] permutation (SMEM)
                    coeff_ref,         # scalar-prefetch: f32[B] coefficients (SMEM)
                    x_ref,             # (1, TS, 128) tile of row i
                    xp_ref,            # (1, TS, 128) tile of row perm[i]
                    xo_ref):           # (1, TS, 128) output tile of row i
    del perm_ref                       # only used by the index_maps
    i = pl.program_id(0)
    c = coeff_ref[i]                   # scalar f32 read from SMEM
    # f32 blend keeps the path valid on v5e (no bf16 VALU); kernel is HBM-bound
    # so the up-cast costs nothing measurable.
    x = x_ref[...].astype(jnp.float32)
    xp = xp_ref[...].astype(jnp.float32)
    xo_ref[...] = (c * x + (1.0 - c) * xp).astype(xo_ref.dtype)


@jax.jit
def mixup_pallas(X, Y, weight, perm, coeffs):
    """Apply mixup. X: (B, ...) any float dtype, Y: (B, NC), weight: (B,) or None."""
    B = X.shape[0]
    orig_shape = X.shape
    x_dtype = X.dtype
    itemsize = jnp.dtype(x_dtype).itemsize

    # Flatten non-batch dims and lay them out as (B, S, 128) lane-dense tiles.
    Xf = X.reshape(B, -1)                      # keep input dtype (no f32 HBM blowup)
    F = Xf.shape[1]
    S = -(-F // _LANES)                        # sublanes per row
    F_pad = S * _LANES
    if F_pad != F:
        # TODO(synk): a masked final lane-tile inside the kernel would avoid
        # this extra pad/slice copy; only triggers when F % 128 != 0.
        Xf = jnp.pad(Xf, ((0, 0), (0, F_pad - F)))
    X3 = Xf.reshape(B, S, _LANES)

    TS, n_ftiles = _choose_tiles(S, x_dtype)

    perm = perm.astype(jnp.int32)
    coeffs = coeffs.astype(jnp.float32)

    grid_spec = pltpu.PrefetchScalarGridSpec(
        num_scalar_prefetch=2,                 # perm, coeffs -> SMEM before the grid
        grid=(B, n_ftiles),
        in_specs=[
            # X tile (i, j)
            pl.BlockSpec((1, TS, _LANES), lambda i, j, p_ref, c_ref: (i, j, 0)),
            # X tile (perm[i], j): random-row gather via the prefetched table
            pl.BlockSpec((1, TS, _LANES), lambda i, j, p_ref, c_ref: (p_ref[i], j, 0)),
        ],
        out_specs=pl.BlockSpec((1, TS, _LANES), lambda i, j, p_ref, c_ref: (i, j, 0)),
    )

    # Pure HBM-bandwidth problem: 3 passes over X, no MXU, no transcendentals.
    bytes_x = B * F_pad * itemsize
    cost = pl.CostEstimate(flops=3 * B * F_pad, transcendentals=0,
                           bytes_accessed=3 * bytes_x)

    block_bytes = TS * _LANES * itemsize
    # 3 double-buffered (1,TS,128) buffers (x, xp, out) + headroom; stays well
    # under every generation's scoped-VMEM limit (incl. v5e's 16 MiB default).
    vmem_limit = max(16 << 20, 6 * block_bytes + (4 << 20))

    # TODO(synk): on v7x, when a full row is << 1 MiB, a manual multi-row-per-
    # step gather (memory_space=pl.ANY + make_async_copy, pattern P4) would
    # amortize the ~0.35 us/step overhead further; not implemented here.
    Xo3 = pl.pallas_call(
        _mixup_x_kernel,
        grid_spec=grid_spec,
        out_shape=jax.ShapeDtypeStruct((B, S, _LANES), x_dtype),
        compiler_params=pltpu.CompilerParams(
            dimension_semantics=("parallel", "parallel"),
            vmem_limit_bytes=int(vmem_limit)),
        cost_estimate=cost,
    )(perm, coeffs, X3, X3)

    Xo = Xo3.reshape(B, F_pad)
    if F_pad != F:
        Xo = Xo[:, :F]
    Xo = Xo.reshape(orig_shape)

    # Y and the optional weight are tiny (<<1% of the bytes): blend them in
    # plain vectorized JAX instead of burdening the kernel with tiny DMAs.
    cy = coeffs.reshape(-1, 1)
    Yo = cy * Y + (1.0 - cy) * Y[perm]
    if weight is None:
        return Xo, Yo
    Wo = coeffs * weight + (1.0 - coeffs) * weight[perm]
    return Xo, Yo, Wo


def mixup_reference(X, Y, weight, perm, coeffs):
    """Pure-JAX reference mirroring the PyTorch forward."""
    n_dims = X.ndim
    c_x = coeffs.reshape((-1,) + (1,) * (n_dims - 1)).astype(jnp.float32)
    Xm = (c_x * X.astype(jnp.float32)
          + (1.0 - c_x) * X[perm].astype(jnp.float32)).astype(X.dtype)
    c_y = coeffs.reshape(-1, 1)
    Ym = c_y * Y + (1.0 - c_y) * Y[perm]
    Wm = coeffs * weight + (1.0 - coeffs) * weight[perm]
    return Xm, Ym, Wm


if __name__ == "__main__":
    key = jax.random.PRNGKey(0)
    k_x, k_y, k_w, k_perm, k_beta = jax.random.split(key, 5)

    B, C, H, W = 2, 4, 16, 16      # X is NCHW, flattened to F = 1024 inside wrapper
    NC = 8                         # number of classes
    mix_beta = 1.0                 # Beta(mix_beta, mix_beta)

    X = jax.random.normal(k_x, (B, C, H, W), dtype=jnp.float32)
    Y = jax.random.uniform(k_y, (B, NC), dtype=jnp.float32)
    weight = jax.random.uniform(k_w, (B,), dtype=jnp.float32)

    # TODO(synk): torch.randperm / Beta.rsample randomness is generated in
    # plain JAX; the mixing hot path (X blend) runs in the Pallas kernel.
    perm = jax.random.permutation(k_perm, B)
    coeffs = jax.random.beta(k_beta, mix_beta, mix_beta, shape=(B,),
                             dtype=jnp.float32)

    Xo, Yo, Wo = mixup_pallas(X, Y, weight, perm, coeffs)
    jax.block_until_ready((Xo, Yo, Wo))

    Xr, Yr, Wr = mixup_reference(X, Y, weight, perm, coeffs)
    assert Xo.dtype == X.dtype, "X dtype changed"
    assert jnp.allclose(Xo, Xr, atol=1e-5), "X mismatch"
    assert jnp.allclose(Yo, Yr, atol=1e-5), "Y mismatch"
    assert jnp.allclose(Wo, Wr, atol=1e-5), "weight mismatch"

    print("KERNEL_OK")
</pallas_src>

<mosaic_0001>
module attributes {stable_mosaic.version = 11 : i64} {
  func.func @_mixup_x_kernel(%arg0: i32, %arg1: i32, %arg2: memref<2xi32, #tpu.memory_space<smem>>, %arg3: memref<2xf32, #tpu.memory_space<smem>>, %arg4: memref<1x8x128xf32, #tpu.memory_space<vmem>>, %arg5: memref<1x8x128xf32, #tpu.memory_space<vmem>>, %arg6: memref<1x8x128xf32, #tpu.memory_space<vmem>>) attributes {dimension_semantics = [#tpu.dimension_semantics<parallel>, #tpu.dimension_semantics<parallel>], iteration_bounds = array<i64: 2, 1>, scalar_prefetch = 2 : i64, scratch_operands = 0 : i64, tpu.core_type = #tpu.core_type<tc>, window_params = [{transform_indices = @transform_0, window_bounds = array<i64: 1, 8, 128>}, {transform_indices = @transform_1, window_bounds = array<i64: 1, 8, 128>}, {transform_indices = @transform_2, window_bounds = array<i64: 1, 8, 128>}]} {
    %0 = arith.index_cast %arg0 : i32 to index
    %1 = memref.load %arg3[%0] : memref<2xf32, #tpu.memory_space<smem>>
    %c0 = arith.constant 0 : index
    %c0_0 = arith.constant 0 : index
    %c0_1 = arith.constant 0 : index
    %2 = vector.load %arg4[%c0, %c0_0, %c0_1] : memref<1x8x128xf32, #tpu.memory_space<vmem>>, vector<1x8x128xf32>
    %c0_2 = arith.constant 0 : index
    %c0_3 = arith.constant 0 : index
    %c0_4 = arith.constant 0 : index
    %3 = vector.load %arg5[%c0_2, %c0_3, %c0_4] : memref<1x8x128xf32, #tpu.memory_space<vmem>>, vector<1x8x128xf32>
    %4 = vector.broadcast %1 : f32 to vector<1x8x128xf32>
    %5 = arith.mulf %4, %2 : vector<1x8x128xf32>
    %cst = arith.constant 1.000000e+00 : f32
    %6 = arith.subf %cst, %1 : f32
    %7 = vector.broadcast %6 : f32 to vector<1x8x128xf32>
    %8 = arith.mulf %7, %3 : vector<1x8x128xf32>
    %9 = arith.addf %5, %8 : vector<1x8x128xf32>
    %c0_5 = arith.constant 0 : index
    %c0_6 = arith.constant 0 : index
    %c0_7 = arith.constant 0 : index
    %10 = vector.load %arg6[%c0_5, %c0_6, %c0_7] : memref<1x8x128xf32, #tpu.memory_space<vmem>>, vector<1x8x128xf32>
    tpu.vector_store %arg6[%c0_5, %c0_6, %c0_7], %9 {strides = array<i32>} : memref<1x8x128xf32, #tpu.memory_space<vmem>>, vector<1x8x128xf32>,
    return
  }
  func.func @transform_0(%arg0: i32, %arg1: i32, %arg2: memref<2xi32, #tpu.memory_space<smem>>, %arg3: memref<2xf32, #tpu.memory_space<smem>>) -> (i32, i32, i32) {
    %c0_i32 = arith.constant 0 : i32
    %c0_i32_0 = arith.constant 0 : i32
    return %arg0, %arg1, %c0_i32 : i32, i32, i32
  }
  func.func @transform_1(%arg0: i32, %arg1: i32, %arg2: memref<2xi32, #tpu.memory_space<smem>>, %arg3: memref<2xf32, #tpu.memory_space<smem>>) -> (i32, i32, i32) {
    %0 = arith.index_cast %arg0 : i32 to index
    %1 = memref.load %arg2[%0] : memref<2xi32, #tpu.memory_space<smem>>
    %c0_i32 = arith.constant 0 : i32
    %c0_i32_0 = arith.constant 0 : i32
    return %1, %arg1, %c0_i32 : i32, i32, i32
  }
  func.func @transform_2(%arg0: i32, %arg1: i32, %arg2: memref<2xi32, #tpu.memory_space<smem>>, %arg3: memref<2xf32, #tpu.memory_space<smem>>) -> (i32, i32, i32) {
    %c0_i32 = arith.constant 0 : i32
    %c0_i32_0 = arith.constant 0 : i32
    return %arg0, %arg1, %c0_i32 : i32, i32, i32
  }
}

</mosaic_0001>

<bundles_post_ra>
// kernel: mixup_pallas.1
= control target key start
LH: loop header
LB: loop body
LE: loop exit
PB: predicated region body
PF: predicated region fallthrough
CT: control target
= control target key end

     0   :  { %s468_s0 = inlined_call_operand.vmem [shape: s32[2], index: 0, kind: input, shape index: {}]   ;;  %s469_s2 = inlined_call_operand.vmem [shape: f32[2,8,128], index: 2, kind: input, shape index: {}, may-alias: {2,3}]   ;;  %s470_s3 = inlined_call_operand.vmem [shape: f32[2,8,128], index: 3, kind: input, shape index: {}, may-alias: {2,3}]   ;;  %s471_s4 = inlined_call_operand.vmem [shape: f32[2,8,128], index: 4, kind: output, shape index: {}]   ;;  %s472_s1 = inlined_call_operand.vmem [shape: f32[2], index: 1, kind: input, shape index: {}]  }
   0x1   :  { %s9_s17 = sshll.u32 %s468_s0, 4  ;;  %s13_s20 = sshll.u32 %s472_s1, 4  ;;  %s10_s17 = int_to_ptr.vmem [resolvable:$true] %s9_s17  ;;  %s14_s20 = int_to_ptr.vmem [resolvable:$true] %s13_s20 }
   0x2   :  { %s352_s21 = scalar_lea.vmem %s10_s17, 16  ;;  %p357_p1 = scmp.lt.s32.totalorder %s10_s17, %s10_s17 }
   0x3   :  { %p353_p0 = scmp.ne.s32.totalorder %s10_s17, %s352_s21  ;;  %p358_p2 = scmp.lt.s32.totalorder %s352_s21, %s352_s21 }
   0x5   :  { %p359_p3 = por %p358_p2, %p357_p1 }
   0x7   :  { %p360_p4 = pnand %p359_p3, %p353_p0 }
   0x9   :  { %363 = shalt.err (!%p360_p4)  }
   0xa   :  { %s402_s22 = smov [#allocation3]   ;;  %s364_s23 = scalar_lea.vmem %s14_s20, 16 }
   0xb   :  { %12 = dma.vmem_to_smem %s10_s17, 16, %s402_s22, [#allocation2] }
   0xc   :  { %p365_p5 = scmp.ne.s32.totalorder %s14_s20, %s364_s23  ;;  %p369_p6 = scmp.lt.s32.totalorder %s14_s20, %s14_s20 }
   0xd   :  { %p370_p7 = scmp.lt.s32.totalorder %s364_s23, %s364_s23 }
   0xf   :  { %p371_p8 = por %p370_p7, %p369_p6 }
  0x11   :  { %p372_p9 = pnand %p371_p8, %p365_p5 }
  0x13   :  { %375 = shalt.err (!%p372_p9)  }
  0x14   :  { %s403_s0 = smov [#allocation4]  }
  0x15   :  { %16 = dma.vmem_to_smem %s14_s20, 16, %s403_s0, [#allocation2] }
  0x16   :  { %388 = dma.done.wait [#allocation2], 32 }
  0x17   :  { %389 = vsyncadd [#allocation2], 4294967264 }
  0x18   :  { %18 = sfence }
  0x19   :  { %s435_s1 = smov 0   ;;  %s437_s24 = smov 0  }
  0x1a   :  { %s439_s25 = smov 0  }
  0x1b LB: > { %s36_s26 = sadd.s32 1, %s396_s24  ;;  %p320_p10 = scmp.ge.s32.totalorder %s400_s25, 1  ;;  %s400_s25 = sphi %s439_s25, %s24_s25   ;;  %s396_s24 = sphi %s437_s24, %s474_s24   ;;  %s392_s1 = sphi %s435_s1, %s473_s1  }
  0x1c   : > { %p38_p11 = scmp.ge.s32.totalorder %s36_s26, 2  ;;  %p160_p12 = scmp.lt.s32.totalorder %s400_s25, 3 }
  0x1e   : > { %s476_s26 = smov (%p38_p11, %s36_s26), 0  ;;  %p161_p13 = pnand %p320_p10, %p160_p12 }
  0x1f   : > { %p194_p0 = scmp.lt.s32.totalorder (!%p161_p13), %s392_s1, 1  ;;  %s201_s27 = sld [smem:[#allocation3 + %s392_s1]] (!%p161_p13) }
  0x20   : > { %164 = sbr.rel (%p161_p13) target bundleno = 49 (0x31), region = 28  ;;  %s217_s28 = sld [smem:[#allocation4 + %s392_s1]] (!%p161_p13) }
  0x25   : > { %p202_p1 = scmp.lt.s32.totalorder (!%p161_p13), %s201_s27, 1 }
  0x26   : > { %s222_s7 = ssub.f32 (!%p161_p13), 1.0, %s217_s28  ;;  %v220_v1 = vstv (!%p161_p13), %s217_s28 }
  0x27   : > { %s478_s1 = smov (!%p194_p0, %s392_s1), 1  ;;  %s480_s27 = smov (!%p202_p1, %s201_s27), 1 }
  0x28   : > { %s321_s29 = sshll.u32 %s478_s1, 3  ;;  %s322_s8 = sshll.u32 %s480_s27, 3  ;;  %v223_v2 = vstv %s222_s7 }
  0x29   : > { %s200_s6 = scalar_lea.vmem %s469_s2, %s321_s29  ;;  %s208_s11 = scalar_lea.vmem %s470_s3, %s322_s8 }
  0x2a   : > { %v218_v0 = vld [vmem:[%s200_s6] sm:$0xff]  ;;  %s216_s14 = scalar_lea.vmem %s471_s4, %s321_s29 }
  0x2b   : > { %v221_v3 = vmul.f32 %v220_v1, %v218_v0  ;;  %v219_v4 = vld [vmem:[%s208_s11] sm:$0xff] }
  0x2c   : > { %v224_v5 = vmul.f32 %v223_v2, %v219_v4 }
  0x2e   : > { %v225_v6 = vadd.f32 %v224_v5, %v221_v3 }
  0x30   : > { %226 = vst [vmem:[%s216_s14] sm:$0xff] %v225_v6 }
  0x31 PF: > { %s24_s25 = sadd.s32 1, %s400_s25   ;;  %s473_s1 = smov %s396_s24 }
  0x32   : > { %p21_p2 = scmp.ge.s32.totalorder %s24_s25, 4   ;;  %s474_s24 = smov %s476_s26 }
  0x34   :  { %23 = sbr.rel (!%p21_p2) target bundleno = 27 (0x1b), region = 61 }

</bundles_post_ra>
